<compile_context>
chip_gen: v7x
topology: tpu7x:2x2x1
jax: 0.10.0
libtpu: 0.0.40
codegen_flags: <defaults>
</compile_context>

<pallas_src>
import jax
import jax.numpy as jnp
from jax.experimental import pallas as pl
from jax.experimental.pallas import tpu as pltpu

INPUT_DIM = 100
HIDDEN_DIM = 128
OUTPUT_DIM = 100


def dqn_kernel(x_ref, w1_ref, b1_ref, w2_ref, b2_ref, w3_ref, b3_ref, o_ref):
    # fc1 + ReLU : bf16 operands, f32 accumulation, f32 bias add
    x = x_ref[...].astype(jnp.bfloat16)
    h1 = jnp.dot(x, w1_ref[...], preferred_element_type=jnp.float32)
    h1 = jnp.maximum(h1 + b1_ref[...], 0.0).astype(jnp.bfloat16)
    # fc2 + ReLU
    h2 = jnp.dot(h1, w2_ref[...], preferred_element_type=jnp.float32)
    h2 = jnp.maximum(h2 + b2_ref[...], 0.0).astype(jnp.bfloat16)
    # fc3 (no activation); direct 100-wide store (masked vst is cheaper than an
    # extra HBM pass to strip padding afterwards)
    h3 = jnp.dot(h2, w3_ref[...], preferred_element_type=jnp.float32)
    o_ref[...] = (h3 + b3_ref[...]).astype(o_ref.dtype)


def _round_up(n, m):
    return (n + m - 1) // m * m


def prepare_params(params_f32):
    """One-time prep outside the hot path: bf16 weights, f32 biases."""
    return {
        "W1": params_f32["W1"].astype(jnp.bfloat16),  # (100, 128)
        "b1": params_f32["b1"].astype(jnp.float32),   # (1, 128)
        "W2": params_f32["W2"].astype(jnp.bfloat16),  # (128, 128)
        "b2": params_f32["b2"].astype(jnp.float32),   # (1, 128)
        "W3": params_f32["W3"].astype(jnp.bfloat16),  # (128, 100)
        "b3": params_f32["b3"].astype(jnpp := jnp.float32),  # (1, 100)
    }


@jax.jit
def dqn_forward(x, params):
    """x: (B, INPUT_DIM) float32. params: output of prepare_params (bf16 W, f32 b)."""
    B = x.shape[0]

    # --- batch tile sizing (static under jit) ---
    if B <= 16:
        TB = B                      # single block == full batch dim (legal, latency-bound anyway)
    else:
        # >=2 grid steps (v7x: both TCs); ~512-row tiles for v5e/v6e HBM roofline.
        n_steps = max(2, pl.cdiv(B, 512))
        TB = _round_up(pl.cdiv(B, n_steps), 8)
    B_pad = _round_up(B, TB)
    x_in = x if B_pad == B else jnp.pad(x, ((0, B_pad - B), (0, 0)))

    grid = (B_pad // TB,)

    # Activations tile over batch; weights/biases have constant index_maps so the
    # pipeline keeps them VMEM-resident across all grid steps.
    act_in_spec = pl.BlockSpec((TB, INPUT_DIM), lambda i: (i, 0))
    act_out_spec = pl.BlockSpec((TB, OUTPUT_DIM), lambda i: (i, 0))
    const_spec = lambda r, c: pl.BlockSpec((r, c), lambda i: (0, 0))

    flops = 2 * B_pad * (INPUT_DIM * HIDDEN_DIM
                         + HIDDEN_DIM * HIDDEN_DIM
                         + HIDDEN_DIM * OUTPUT_DIM)
    bytes_accessed = (
        4 * B_pad * INPUT_DIM                                   # x (f32)
        + 2 * (INPUT_DIM * HIDDEN_DIM + HIDDEN_DIM * HIDDEN_DIM
               + HIDDEN_DIM * OUTPUT_DIM)                       # W1,W2,W3 (bf16)
        + 4 * (2 * HIDDEN_DIM + OUTPUT_DIM)                     # biases (f32)
        + 4 * B_pad * OUTPUT_DIM                                # out (f32)
    )

    out = pl.pallas_call(
        dqn_kernel,
        out_shape=jax.ShapeDtypeStruct((B_pad, OUTPUT_DIM), jnp.float32),
        grid=grid,
        in_specs=[
            act_in_spec,                           # x
            const_spec(INPUT_DIM, HIDDEN_DIM),     # W1 (100,128), K padded internally by Mosaic
            const_spec(1, HIDDEN_DIM),             # b1
            const_spec(HIDDEN_DIM, HIDDEN_DIM),    # W2
            const_spec(1, HIDDEN_DIM),             # b2
            const_spec(HIDDEN_DIM, OUTPUT_DIM),    # W3 (128,100)
            const_spec(1, OUTPUT_DIM),             # b3
        ],
        out_specs=act_out_spec,
        compiler_params=pltpu.CompilerParams(
            dimension_semantics=("parallel",),     # v7x: shard batch grid across both TCs
        ),
        cost_estimate=pl.CostEstimate(
            flops=flops, transcendentals=0, bytes_accessed=bytes_accessed
        ),
    )(x_in, params["W1"], params["b1"], params["W2"], params["b2"],
      params["W3"], params["b3"])

    return out if B_pad == B else out[:B]


def init_params(key):
    """Deterministic synthetic f32 parameters (shapes from DQN.__init__)."""
    ks = jax.random.split(key, 6)

    def lin(kw, kb, fan_in, fan_out):
        # PyTorch default init: U(-1/sqrt(fan_in), 1/sqrt(fan_in))
        bound = 1.0 / jnp.sqrt(jnp.float32(fan_in))
        W = jax.random.uniform(kw, (fan_in, fan_out), jnp.float32, -bound, bound)
        b = jax.random.uniform(kb, (1, fan_out), jnp.float32, -bound, bound)
        return W, b

    W1, b1 = lin(ks[0], ks[1], INPUT_DIM, HIDDEN_DIM)
    W2, b2 = lin(ks[2], ks[3], HIDDEN_DIM, HIDDEN_DIM)
    W3, b3 = lin(ks[4], ks[5], HIDDEN_DIM, OUTPUT_DIM)
    return {"W1": W1, "b1": b1, "W2": W2, "b2": b2, "W3": W3, "b3": b3}


def reference_forward(x, p):
    """Pure-JAX reference using the same bf16-operand / f32-accumulate recipe."""
    xb = x.astype(jnp.bfloat16)
    h1 = jnp.maximum(
        jnp.dot(xb, p["W1"], preferred_element_type=jnp.float32) + p["b1"], 0.0
    ).astype(jnp.bfloat16)
    h2 = jnp.maximum(
        jnp.dot(h1, p["W2"], preferred_element_type=jnp.float32) + p["b2"], 0.0
    ).astype(jnp.bfloat16)
    return jnp.dot(h2, p["W3"], preferred_element_type=jnp.float32) + p["b3"]


if __name__ == "__main__":
    key = jax.random.PRNGKey(0)
    kx, kp = jax.random.split(key)

    params_f32 = init_params(kp)
    params = prepare_params(params_f32)   # bf16 weights, prepared once

    # Small batch (single-block path).
    batch = 8
    x = jax.random.normal(kx, (batch, INPUT_DIM), dtype=jnp.float32)
    out = jax.block_until_ready(dqn_forward(x, params))
    ref = reference_forward(x, params)
    assert out.shape == (batch, OUTPUT_DIM), out.shape
    assert jnp.allclose(out, ref, atol=1e-2, rtol=1e-2), "mismatch vs JAX reference"

    # Larger, non-multiple batch: exercises multi-step pipelined grid + ragged padding.
    big_b = 300
    xb = jax.random.normal(kx, (big_b, INPUT_DIM), dtype=jnp.float32)
    outb = jax.block_until_ready(dqn_forward(xb, params))
    refb = reference_forward(xb, params)
    assert outb.shape == (big_b, OUTPUT_DIM), outb.shape
    assert jnp.allclose(outb, refb, atol=1e-2, rtol=1e-2), "mismatch (large batch)"

    print("KERNEL_OK")
</pallas_src>

<mosaic_0001>
module attributes {stable_mosaic.version = 11 : i64} {
  func.func @dqn_kernel(%arg0: i32, %arg1: memref<8x100xf32, #tpu.memory_space<vmem>>, %arg2: memref<100x128xbf16, #tpu.memory_space<vmem>>, %arg3: memref<1x128xf32, #tpu.memory_space<vmem>>, %arg4: memref<128x128xbf16, #tpu.memory_space<vmem>>, %arg5: memref<1x128xf32, #tpu.memory_space<vmem>>, %arg6: memref<128x100xbf16, #tpu.memory_space<vmem>>, %arg7: memref<1x100xf32, #tpu.memory_space<vmem>>, %arg8: memref<8x100xf32, #tpu.memory_space<vmem>>) attributes {dimension_semantics = [#tpu.dimension_semantics<parallel>], iteration_bounds = array<i64: 1>, scalar_prefetch = 0 : i64, scratch_operands = 0 : i64, tpu.core_type = #tpu.core_type<tc>, window_params = [{transform_indices = @transform_0, window_bounds = array<i64: 8, 100>}, {pipeline_mode = #tpu.pipeline_mode<synchronous>, transform_indices = @transform_1, window_bounds = array<i64: 100, 128>}, {pipeline_mode = #tpu.pipeline_mode<synchronous>, transform_indices = @transform_2, window_bounds = array<i64: 1, 128>}, {pipeline_mode = #tpu.pipeline_mode<synchronous>, transform_indices = @transform_3, window_bounds = array<i64: 128, 128>}, {pipeline_mode = #tpu.pipeline_mode<synchronous>, transform_indices = @transform_4, window_bounds = array<i64: 1, 128>}, {pipeline_mode = #tpu.pipeline_mode<synchronous>, transform_indices = @transform_5, window_bounds = array<i64: 128, 100>}, {pipeline_mode = #tpu.pipeline_mode<synchronous>, transform_indices = @transform_6, window_bounds = array<i64: 1, 100>}, {transform_indices = @transform_7, window_bounds = array<i64: 8, 100>}]} {
    %c0 = arith.constant 0 : index
    %c0_0 = arith.constant 0 : index
    %0 = vector.load %arg1[%c0, %c0_0] : memref<8x100xf32, #tpu.memory_space<vmem>>, vector<8x100xf32>
    %1 = arith.truncf %0 : vector<8x100xf32> to vector<8x100xbf16>
    %c0_1 = arith.constant 0 : index
    %c0_2 = arith.constant 0 : index
    %2 = vector.load %arg2[%c0_1, %c0_2] : memref<100x128xbf16, #tpu.memory_space<vmem>>, vector<100x128xbf16>
    %cst = arith.constant dense<0.000000e+00> : vector<8x128xf32>
    %3 = tpu.matmul %1, %2, %cst {dimension_numbers = #tpu.dot_dimension_numbers<[1], [0], [0], [1], [0, 0, 1, 1], [], []>} : vector<8x100xbf16>, vector<100x128xbf16>, vector<8x128xf32> -> vector<8x128xf32>
    %c0_3 = arith.constant 0 : index
    %c0_4 = arith.constant 0 : index
    %4 = vector.load %arg3[%c0_3, %c0_4] : memref<1x128xf32, #tpu.memory_space<vmem>>, vector<1x128xf32>
    %5 = vector.broadcast %4 : vector<1x128xf32> to vector<8x128xf32>
    %6 = arith.addf %3, %5 : vector<8x128xf32>
    %cst_5 = arith.constant 0.000000e+00 : f32
    %7 = vector.broadcast %cst_5 : f32 to vector<8x128xf32>
    %8 = arith.maximumf %6, %7 : vector<8x128xf32>
    %9 = arith.truncf %8 : vector<8x128xf32> to vector<8x128xbf16>
    %c0_6 = arith.constant 0 : index
    %c0_7 = arith.constant 0 : index
    %10 = vector.load %arg4[%c0_6, %c0_7] : memref<128x128xbf16, #tpu.memory_space<vmem>>, vector<128x128xbf16>
    %cst_8 = arith.constant dense<0.000000e+00> : vector<8x128xf32>
    %11 = tpu.matmul %9, %10, %cst_8 {dimension_numbers = #tpu.dot_dimension_numbers<[1], [0], [0], [1], [0, 0, 1, 1], [], []>} : vector<8x128xbf16>, vector<128x128xbf16>, vector<8x128xf32> -> vector<8x128xf32>
    %c0_9 = arith.constant 0 : index
    %c0_10 = arith.constant 0 : index
    %12 = vector.load %arg5[%c0_9, %c0_10] : memref<1x128xf32, #tpu.memory_space<vmem>>, vector<1x128xf32>
    %13 = vector.broadcast %12 : vector<1x128xf32> to vector<8x128xf32>
    %14 = arith.addf %11, %13 : vector<8x128xf32>
    %cst_11 = arith.constant 0.000000e+00 : f32
    %15 = vector.broadcast %cst_11 : f32 to vector<8x128xf32>
    %16 = arith.maximumf %14, %15 : vector<8x128xf32>
    %17 = arith.truncf %16 : vector<8x128xf32> to vector<8x128xbf16>
    %c0_12 = arith.constant 0 : index
    %c0_13 = arith.constant 0 : index
    %18 = vector.load %arg6[%c0_12, %c0_13] : memref<128x100xbf16, #tpu.memory_space<vmem>>, vector<128x100xbf16>
    %cst_14 = arith.constant dense<0.000000e+00> : vector<8x100xf32>
    %19 = tpu.matmul %17, %18, %cst_14 {dimension_numbers = #tpu.dot_dimension_numbers<[1], [0], [0], [1], [0, 0, 1, 1], [], []>} : vector<8x128xbf16>, vector<128x100xbf16>, vector<8x100xf32> -> vector<8x100xf32>
    %c0_15 = arith.constant 0 : index
    %c0_16 = arith.constant 0 : index
    %20 = vector.load %arg7[%c0_15, %c0_16] : memref<1x100xf32, #tpu.memory_space<vmem>>, vector<1x100xf32>
    %21 = vector.broadcast %20 : vector<1x100xf32> to vector<8x100xf32>
    %22 = arith.addf %19, %21 : vector<8x100xf32>
    %c0_17 = arith.constant 0 : index
    %c0_18 = arith.constant 0 : index
    %23 = vector.load %arg8[%c0_17, %c0_18] : memref<8x100xf32, #tpu.memory_space<vmem>>, vector<8x100xf32>
    tpu.vector_store %arg8[%c0_17, %c0_18], %22 {strides = array<i32>} : memref<8x100xf32, #tpu.memory_space<vmem>>, vector<8x100xf32>,
    return
  }
  func.func @transform_0(%arg0: i32) -> (i32, i32) {
    %c0_i32 = arith.constant 0 : i32
    %c0_i32_0 = arith.constant 0 : i32
    return %arg0, %c0_i32 : i32, i32
  }
  func.func @transform_1(%arg0: i32) -> (i32, i32) {
    %c0_i32 = arith.constant 0 : i32
    %c0_i32_0 = arith.constant 0 : i32
    %c0_i32_1 = arith.constant 0 : i32
    return %c0_i32, %c0_i32_0 : i32, i32
  }
  func.func @transform_2(%arg0: i32) -> (i32, i32) {
    %c0_i32 = arith.constant 0 : i32
    %c0_i32_0 = arith.constant 0 : i32
    %c0_i32_1 = arith.constant 0 : i32
    return %c0_i32, %c0_i32_0 : i32, i32
  }
  func.func @transform_3(%arg0: i32) -> (i32, i32) {
    %c0_i32 = arith.constant 0 : i32
    %c0_i32_0 = arith.constant 0 : i32
    %c0_i32_1 = arith.constant 0 : i32
    return %c0_i32, %c0_i32_0 : i32, i32
  }
  func.func @transform_4(%arg0: i32) -> (i32, i32) {
    %c0_i32 = arith.constant 0 : i32
    %c0_i32_0 = arith.constant 0 : i32
    %c0_i32_1 = arith.constant 0 : i32
    return %c0_i32, %c0_i32_0 : i32, i32
  }
  func.func @transform_5(%arg0: i32) -> (i32, i32) {
    %c0_i32 = arith.constant 0 : i32
    %c0_i32_0 = arith.constant 0 : i32
    %c0_i32_1 = arith.constant 0 : i32
    return %c0_i32, %c0_i32_0 : i32, i32
  }
  func.func @transform_6(%arg0: i32) -> (i32, i32) {
    %c0_i32 = arith.constant 0 : i32
    %c0_i32_0 = arith.constant 0 : i32
    %c0_i32_1 = arith.constant 0 : i32
    return %c0_i32, %c0_i32_0 : i32, i32
  }
  func.func @transform_7(%arg0: i32) -> (i32, i32) {
    %c0_i32 = arith.constant 0 : i32
    %c0_i32_0 = arith.constant 0 : i32
    return %arg0, %c0_i32 : i32, i32
  }
}

</mosaic_0001>

<bundles_post_ra>
// kernel: dqn_forward.1
= control target key start
LH: loop header
LB: loop body
LE: loop exit
PB: predicated region body
PF: predicated region fallthrough
CT: control target
= control target key end

     0   :  { %12 = vsyncpa [#allocation3], 0  ;;  %s754_s0 = inlined_call_operand.hbm [shape: f32[8,100], index: 0, kind: input, shape index: {}]   ;;  %s755_s1 = inlined_call_operand.vmem [shape: bf16[100,128], index: 1, kind: input, shape index: {}]   ;;  %s756_s2 = inlined_call_operand.vmem [shape: f32[1,128], index: 2, kind: input, shape index: {}]   ;;  %s757_s3 = inlined_call_operand.vmem [shape: bf16[128,128], index: 3, kind: input, shape index: {}]   ;;  %s758_s4 = inlined_call_operand.vmem [shape: f32[1,128], index: 4, kind: input, shape index: {}]   ;;  %s759_s5 = inlined_call_operand.vmem [shape: bf16[128,100], index: 5, kind: input, shape index: {}]   ;;  %s760_s6 = inlined_call_operand.vmem [shape: f32[1,100], index: 6, kind: input, shape index: {}]   ;;  %s761_s7 = inlined_call_operand.hbm [shape: f32[8,100], index: 7, kind: output, shape index: {}]  }
   0x1   :  { %13 = vsyncpa [#allocation4], 0  ;;  %s577_s24 = smov [#allocation2]   ;;  %s529_s28 = scalar_lea.hbm %s754_s0, 128 }
   0x2   :  { %s20_s25 = sshll.u32 %s577_s24, 4  ;;  %p530_p0 = scmp.ne.s32.totalorder %s754_s0, %s529_s28  ;;  %s21_s25 = int_to_ptr.vmem [resolvable:$true] %s20_s25 }
   0x3   :  { %p533_p1 = scmp.lt.u32.totalorder %s529_s28, %s754_s0 }
   0x5   :  { %p535_p2 = pnand %p533_p1, %p530_p0 }
   0x7   :  { %538 = shalt.err (!%p535_p2)
}
   0x8   :  { %s539_s10 = scalar_lea.vmem %s21_s25, 128  ;;  %p544_p4 = scmp.lt.s32.totalorder %s21_s25, %s21_s25 }
   0x9   :  { %p540_p3 = scmp.ne.s32.totalorder %s21_s25, %s539_s10  ;;  %p545_p5 = scmp.lt.s32.totalorder %s539_s10, %s539_s10 }
   0xb   :  { %p546_p6 = por %p545_p5, %p544_p4 }
   0xd   :  { %p547_p7 = pnand %p546_p6, %p540_p3 }
   0xf   :  { %550 = shalt.err (!%p547_p7)
}
  0x10   :  { %23 = dma.hbm_to_vmem [thread:$0]  %s754_s0, 128, %s21_s25, [#allocation3]  }
  0x11   :  { %573 = dma.done.wait [#allocation3], 128  }
  0x12   :  { %574 = vsyncadd [#allocation3], 4294967168  ;;  %v578_v0 = vmov 0.0   ;;  %vm579_vm0 = vmmov 0   ;;  %v506_v1 = vld [vmem:[%s755_s1] sm:$0xff]   ;;  %v507_v2 = vld [vmem:[%s755_s1 + $0x8] sm:$0xff]  }
  0x13   :  { %444 = vmatprep.subr.bf16.mxu0 %v578_v0  ;;  %458 = vmatprep.mubr.msk.bf16.mxu0 %vm579_vm0, %v578_v0  ;;  %v508_v3 = vld [vmem:[%s755_s1 + $0x10] sm:$0xff]   ;;  %v513_v4 = vld [vmem:[%s757_s3] sm:$0xff]   ;;  %v514_v5 = vld [vmem:[%s757_s3 + $0x8] sm:$0xff]   ;;  %vm105_vm1 = vcmask 1041408   ;;  %vm101_vm2 = vcmask 818176   ;;  %s580_s13 = smov [#allocation5]  }
  0x14   :  { %462 = vmatprep.subr.bf16.mxu1 %v578_v0  ;;  %478 = vmatprep.mubr.msk.bf16.mxu1 %vm579_vm0, %v578_v0  ;;  %v509_v6 = vld [vmem:[%s755_s1 + $0x18] sm:$0xff]   ;;  %v510_v7 = vld [vmem:[%s755_s1 + $0x20] sm:$0xff]   ;;  %v515_v8 = vld [vmem:[%s757_s3 + $0x10] sm:$0xff]   ;;  %s382_s14 = sshll.u32 %s580_s13, 4  ;;  %s383_s14 = int_to_ptr.vmem [resolvable:$true] %s382_s14 }
  0x15   :  { %445 = vmatpush3.bf16.msra.mxu0 %v506_v1  ;;  %463 = vmatpush3.bf16.msra.mxu1 %v513_v4  ;;  %v516_v9 = vld [vmem:[%s757_s3 + $0x18] sm:$0xff]   ;;  %v511_v10 = vld [vmem:[%s755_s1 + $0x28] sm:$0xff]   ;;  %v512_v11 = vld [vmem:[%s755_s1 + $0x30] ss:$0 sps:$4 sm:$0x33]   ;;  %p556_p9 = scmp.lt.s32.totalorder %s383_s14, %s383_s14 }
  0x16   :  { %446 = vmatprep.subr.bf16.mxu0 %v578_v0  ;;  %464 = vmatprep.subr.bf16.mxu1 %v578_v0  ;;  %v517_v12 = vld [vmem:[%s757_s3 + $0x20] sm:$0xff]   ;;  %v107_v14 = vsel %vm105_vm1, %v512_v11, 0  ;;  %v518_v16 = vld [vmem:[%s757_s3 + $0x28] sm:$0xff]   ;;  %v519_v17 = vld [vmem:[%s757_s3 + $0x30] sm:$0xff]  }
  0x17   :  { %v40_v13 = vld [vmem:[#allocation2] sm:$0xff]  ;;  %v520_v18 = vld [vmem:[%s757_s3 + $0x38] sm:$0xff]   ;;  %v522_v20 = vld [vmem:[%s759_s5 + $0x8] sm:$0xff]  }
  0x18   :  { %v41_v15 = vpack.c.bf16 %v40_v13, %v40_v13  ;;  %v521_v19 = vld [vmem:[%s759_s5] sm:$0xff]   ;;  %v523_v21 = vld [vmem:[%s759_s5 + $0x10] sm:$0xff]   ;;  %v524_v22 = vld [vmem:[%s759_s5 + $0x18] sm:$0xff]  }
  0x19   :  { %447 = vmatpush3.bf16.msra.mxu0 %v507_v2  ;;  %465 = vmatpush3.bf16.msra.mxu1 %v514_v5  ;;  %v525_v23 = vld [vmem:[%s759_s5 + $0x20] sm:$0xff]   ;;  %v526_v24 = vld [vmem:[%s759_s5 + $0x28] sm:$0xff]   ;;  %v527_v33 = vld [vmem:[%s759_s5 + $0x30] sm:$0xff]  }
  0x1a   :  { %448 = vmatprep.subr.bf16.mxu0 %v578_v0  ;;  %466 = vmatprep.subr.bf16.mxu1 %v578_v0  ;;  %v391_v25 = vld [vmem:[%s756_s2] ss:$0 sm:$0xff]  ;;  %v528_v34 = vld [vmem:[%s759_s5 + $0x38] sm:$0xff]  }
  0x1b   :  { %v400_v35 = vld [vmem:[%s758_s4] ss:$0 sm:$0xff]  ;;  %s551_s4 = scalar_lea.vmem %s383_s14, 128 }
  0x1c   :  { %v409_v43 = vld [vmem:[%s760_s6] ss:$0 sm:$0xff]  ;;  %p552_p8 = scmp.ne.s32.totalorder %s383_s14, %s551_s4  ;;  %p557_p10 = scmp.lt.s32.totalorder %s551_s4, %s551_s4 }
  0x1d   :  { %449 = vmatpush3.bf16.msra.mxu0 %v508_v3  ;;  %467 = vmatpush3.bf16.msra.mxu1 %v515_v8 }
  0x1e   :  { %450 = vmatprep.subr.bf16.mxu0 %v578_v0  ;;  %468 = vmatprep.subr.bf16.mxu1 %v578_v0  ;;  %p558_p11 = por %p557_p10, %p556_p9 }
  0x20   :  { %p559_p12 = pnand %p558_p11, %p552_p8 }
  0x21   :  { %451 = vmatpush3.bf16.msra.mxu0 %v509_v6  ;;  %469 = vmatpush3.bf16.msra.mxu1 %v516_v9 }
  0x22   :  { %452 = vmatprep.subr.bf16.mxu0 %v578_v0  ;;  %470 = vmatprep.subr.bf16.mxu1 %v578_v0 }
  0x25   :  { %453 = vmatpush3.bf16.msra.mxu0 %v510_v7  ;;  %471 = vmatpush3.bf16.msra.mxu1 %v517_v12 }
  0x26   :  { %454 = vmatprep.subr.bf16.mxu0 %v578_v0  ;;  %472 = vmatprep.subr.bf16.mxu1 %v578_v0 }
  0x29   :  { %455 = vmatpush3.bf16.msra.mxu0 %v511_v10  ;;  %473 = vmatpush3.bf16.msra.mxu1 %v518_v16 }
  0x2a   :  { %456 = vmatprep.subr.bf16.mxu0 %v578_v0  ;;  %474 = vmatprep.subr.bf16.mxu1 %v578_v0 }
  0x2d   :  { %457 = vmatpush3.bf16.msra.mxu0 %v107_v14  ;;  %475 = vmatpush3.bf16.msra.mxu1 %v519_v17 }
  0x2e   :  { %482 = vmatprep.subr.bf16.mxu0 %v578_v0  ;;  %476 = vmatprep.subr.bf16.mxu1 %v578_v0 }
  0x30   :  { %459 = vmatmul.mubr.msk.bf16.vlgmr.msra.gmra.mrb[0].mxu0 %vm101_vm2, %v41_v15 }
  0x31   :  { %498 = vmatprep.mubr.msk.bf16.mxu0 %vm579_vm0, %v578_v0  ;;  %477 = vmatpush3.bf16.msra.mxu1 %v520_v18 }
  0x32   :  { %483 = vmatpush3.bf16.msra.mxu0 %v521_v19 }
  0x33   :  { %484 = vmatprep.subr.bf16.mxu0 %v578_v0 }
  0x36   :  { %485 = vmatpush3.bf16.msra.mxu0 %v522_v20 }
  0x37   :  { %486 = vmatprep.subr.bf16.mxu0 %v578_v0 }
  0x3a   :  { %487 = vmatpush3.bf16.msra.mxu0 %v523_v21 }
  0x3b   :  { %488 = vmatprep.subr.bf16.mxu0 %v578_v0 }
  0x3e   :  { %489 = vmatpush3.bf16.msra.mxu0 %v524_v22 }
  0x3f   :  { %490 = vmatprep.subr.bf16.mxu0 %v578_v0 }
  0x42   :  { %491 = vmatpush3.bf16.msra.mxu0 %v525_v23 }
  0x43   :  { %492 = vmatprep.subr.bf16.mxu0 %v578_v0 }
  0x46   :  { %493 = vmatpush3.bf16.msra.mxu0 %v526_v24 }
  0x47   :  { %494 = vmatprep.subr.bf16.mxu0 %v578_v0 }
  0x4a   :  { %495 = vmatpush3.bf16.msra.mxu0 %v527_v33 }
  0x4b   :  { %496 = vmatprep.subr.bf16.mxu0 %v578_v0 }
  0x4e   :  { %497 = vmatpush3.bf16.msra.mxu0 %v528_v34 }
 0x103   :  { %v143_v26 = vpop.f32.mrb[0].mxu0 }
 0x104   :  { %v144_v27 = vadd.f32 %v391_v25, %v143_v26  ;;  %v460_v28 = vpop.f32.mrb[1].mxu0 }
 0x105   :  { %v146_v29 = vpop.f32.mrb[2].mxu0 }
 0x106   :  { %v149_v30 = vmax.f32 %v144_v27, 0.0  ;;  %v461_v31 = vpop.f32.mrb[3].mxu0 }
 0x108   :  { %v150_v32 = vpack.c.bf16 %v149_v30, %v149_v30 }
 0x10a   :  { %479 = vmatmul.mubr.bf16.vlgmr.msra.gmra.mrb[0].mxu1 %v150_v32 }
 0x1dd   :  { %v256_v36 = vpop.f32.mrb[0].mxu1 }
 0x1de   :  { %v257_v37 = vadd.f32 %v400_v35, %v256_v36  ;;  %v480_v38 = vpop.f32.mrb[1].mxu1 }
 0x1df   :  { %v259_v39 = vpop.f32.mrb[2].mxu1 }
 0x1e0   :  { %v262_v40 = vmax.f32 %v257_v37, 0.0  ;;  %v481_v41 = vpop.f32.mrb[3].mxu1 }
 0x1e2   :  { %v263_v42 = vpack.c.bf16 %v262_v40, %v262_v40 }
 0x1e4   :  { %499 = vmatmul.mubr.bf16.vlgmr.msra.gmra.mrb[4].mxu0 %v263_v42 }
 0x2b7   :  { %v369_v44 = vpop.f32.mrb[4].mxu0 }
 0x2b8   :  { %v370_v45 = vadd.f32 %v409_v43, %v369_v44  ;;  %v500_v46 = vpop.f32.mrb[5].mxu0 }
 0x2b9   :  { %v372_v47 = vpop.f32.mrb[6].mxu0 }
 0x2ba   :  { %375 = vst.msk [vmem:[#allocation5] sm:$0xff] %vm101_vm2, %v370_v45  ;;  %v501_v48 = vpop.f32.mrb[7].mxu0 }
 0x2bb   :  { %562 = shalt.err (!%p559_p12)
}
 0x2bc   :  { %s563_s6 = scalar_lea.hbm %s761_s7, 128 }
 0x2bd   :  { %p564_p13 = scmp.ne.s32.totalorder %s761_s7, %s563_s6  ;;  %p567_p0 = scmp.lt.u32.totalorder %s563_s6, %s761_s7 }
 0x2bf   :  { %p569_p1 = pnand %p567_p0, %p564_p13 }
 0x2c1   :  { %572 = shalt.err (!%p569_p1)
}
 0x2c2   :  { %385 = dma.vmem_to_hbm [thread:$0]  %s383_s14, 128, %s761_s7, [#allocation4]  }
 0x2c3   :  { %575 = dma.done.wait [#allocation4], 128  }
 0x2c4   :  { %576 = vsyncadd [#allocation4], 4294967168 }
 0x2c5   :  { %389 = vsyncpa [#allocation3], 1 }
 0x2c6   :  { %390 = vsyncpa [#allocation4], 1 }

</bundles_post_ra>
